<compile_context>
chip_gen: v7x
topology: tpu7x:2x2x1
jax: 0.10.0
libtpu: 0.0.40
codegen_flags: <defaults>
</compile_context>

<pallas_src>
import functools
import math

import jax
import jax.numpy as jnp
from jax.experimental import pallas as pl
from jax.experimental.pallas import tpu as pltpu


def _round_up(x, m):
    return ((x + m - 1) // m) * m


def _patch_embed_kernel(x_ref, w_ref, b_ref, o_ref):
    # x_ref: (TM, K)  w_ref: (K, N)  b_ref: (1, N)  o_ref: (TM, N)
    acc = jnp.dot(x_ref[...], w_ref[...], preferred_element_type=jnp.float32)
    o_ref[...] = (acc + b_ref[...]).astype(o_ref.dtype)


def _choose_fold(num_patches, d_model, max_inflation=8):
    """Smallest G dividing num_patches with N = G*d_model a multiple of 128
    (unmasked full-lane stores).  Flop inflation of the block-diagonal weight
    equals G, so it is capped at `max_inflation` to stay memory-bound on every
    generation (v5e f32 MXU included)."""
    divisors = [g for g in range(1, min(num_patches, max_inflation) + 1)
                if num_patches % g == 0]
    for g in divisors:
        if (g * d_model) % 128 == 0:
            return g
    return divisors[-1]   # fallback: best lane fill within the inflation budget


def _choose_tm(M, row_bytes):
    """M-tile: multiple of 8, >=2 grid steps when M > 8 (pipelining + v7x
    megacore), 512-2048-row tiles for large M to amortize the ~0.35us/step
    overhead, double-buffered footprint capped at a few MiB."""
    if M <= 8:
        return M                                   # single tiny tile == full array
    tm = max(512, _round_up(pl.cdiv(M, 8), 8))     # aim for ~8 steps, >=512 rows
    tm = min(tm, 2048)
    tm = min(tm, _round_up(pl.cdiv(M, 2), 8))      # but always >=2 grid steps
    vmem_cap_rows = max(8, ((8 << 20) // (2 * row_bytes)) // 8 * 8)
    return max(8, min(tm, vmem_cap_rows))


def patch_embeddings_forward(x, weight, bias, *, feature_size, patch_size, d_model):
    """x: (B, feature_size) f32; weight: (d_model, patch_size); bias: (d_model,)."""
    B = x.shape[0]
    num_patches = math.ceil(feature_size / patch_size)
    pad_size = num_patches * patch_size - feature_size

    # ---- fold G patches per matmul row (G | num_patches -> free reshapes) ---
    G = _choose_fold(num_patches, d_model)
    K = G * patch_size                     # folded contraction dim (= full dim)
    N = G * d_model                        # folded output dim (128-multiple here)
    M = B * num_patches // G               # exact number of folded rows, no padding

    # ---- glue: tail-pad features (skipped when pad_size == 0), free reshapes -
    if pad_size:
        x = jnp.pad(x, ((0, 0), (0, pad_size)))          # (B, num_patches*patch_size)
    x2d = x.reshape(M, K)                                 # contiguous view reshape

    # Block-diagonal weight (K, N) = kron(I_G, W.T); bias tiled G times (16 KiB).
    w_bd = jnp.kron(jnp.eye(G, dtype=weight.dtype), weight.T)   # (K, N)
    b_bd = jnp.tile(bias, G).reshape(1, N)                       # (1, N)

    # ---- M tiling ------------------------------------------------------------
    TM = _choose_tm(M, row_bytes=4 * (K + N))
    grid = (pl.cdiv(M, TM),)                              # ragged last tile OK

    # Double-buffered footprint: 2*(in+out tile) + 2*(weight+bias); tiny (~ a few
    # MiB max), so a 16 MiB scoped limit is safe on v5e/v6e/v7x alike.
    vmem_needed = 2 * 4 * TM * (K + N) + 2 * 4 * (K * N + N)
    vmem_limit = int(min(32 << 20, max(16 << 20, 4 * vmem_needed)))

    cost = pl.CostEstimate(
        flops=2 * M * K * N,
        transcendentals=0,
        bytes_accessed=4 * (M * K + K * N + N + M * N),
    )

    out2d = pl.pallas_call(
        _patch_embed_kernel,
        out_shape=jax.ShapeDtypeStruct((M, N), x.dtype),
        grid=grid,
        in_specs=[
            pl.BlockSpec((TM, K), lambda i: (i, 0)),   # activation tiles stream
            pl.BlockSpec((K, N), lambda i: (0, 0)),    # block-diag weight resident
            pl.BlockSpec((1, N), lambda i: (0, 0)),    # bias resident
        ],
        out_specs=pl.BlockSpec((TM, N), lambda i: (i, 0)),
        compiler_params=pltpu.CompilerParams(
            dimension_semantics=("parallel",),          # shard M across v7x's 2 TCs
            vmem_limit_bytes=vmem_limit,
        ),
        cost_estimate=cost,
    )(x2d, w_bd, b_bd)

    # (M, G*d_model) -> (B, num_patches, d_model): contiguous view, no slice.
    return out2d.reshape(B, num_patches, d_model)


def _reference(x, weight, bias, *, feature_size, patch_size, d_model):
    B = x.shape[0]
    num_patches = math.ceil(feature_size / patch_size)
    pad_size = num_patches * patch_size - feature_size
    x_pad = jnp.pad(x, ((0, 0), (0, pad_size)))
    xp = x_pad.reshape(B, num_patches, patch_size)
    return jnp.einsum("bpk,nk->bpn", xp, weight) + bias


if __name__ == "__main__":
    # Small shapes consistent with the module: feature_size not a multiple of
    # patch_size so the padding path is exercised.
    B = 2
    feature_size = 60
    patch_size = 8
    d_model = 32

    key = jax.random.PRNGKey(0)
    kx, kw, kb = jax.random.split(key, 3)

    x = jax.random.normal(kx, (B, feature_size), dtype=jnp.float32)

    # Deterministic nn.Linear(patch_size, d_model)-style init: U(-1/sqrt(in), 1/sqrt(in)).
    bound = 1.0 / math.sqrt(patch_size)
    weight = jax.random.uniform(kw, (d_model, patch_size), jnp.float32, -bound, bound)
    bias = jax.random.uniform(kb, (d_model,), jnp.float32, -bound, bound)

    fwd = jax.jit(functools.partial(
        patch_embeddings_forward,
        feature_size=feature_size, patch_size=patch_size, d_model=d_model,
    ))
    out = jax.block_until_ready(fwd(x, weight, bias))

    ref = _reference(
        x, weight, bias,
        feature_size=feature_size, patch_size=patch_size, d_model=d_model,
    )

    assert out.shape == (B, math.ceil(feature_size / patch_size), d_model), out.shape
    assert jnp.allclose(out, ref, atol=1e-5, rtol=1e-5), "mismatch vs reference"
    print("KERNEL_OK")
</pallas_src>

<mosaic_0001>
module attributes {stable_mosaic.version = 11 : i64} {
  func.func @_patch_embed_kernel(%arg0: i32, %arg1: memref<4x32xf32, #tpu.memory_space<vmem>>, %arg2: memref<32x128xf32, #tpu.memory_space<vmem>>, %arg3: memref<1x128xf32, #tpu.memory_space<vmem>>, %arg4: memref<4x128xf32, #tpu.memory_space<vmem>>) attributes {dimension_semantics = [#tpu.dimension_semantics<parallel>], iteration_bounds = array<i64: 1>, scalar_prefetch = 0 : i64, scratch_operands = 0 : i64, tpu.core_type = #tpu.core_type<tc>, window_params = [{transform_indices = @transform_0, window_bounds = array<i64: 4, 32>}, {pipeline_mode = #tpu.pipeline_mode<synchronous>, transform_indices = @transform_1, window_bounds = array<i64: 32, 128>}, {pipeline_mode = #tpu.pipeline_mode<synchronous>, transform_indices = @transform_2, window_bounds = array<i64: 1, 128>}, {transform_indices = @transform_3, window_bounds = array<i64: 4, 128>}]} {
    %c0 = arith.constant 0 : index
    %c0_0 = arith.constant 0 : index
    %0 = vector.load %arg1[%c0, %c0_0] : memref<4x32xf32, #tpu.memory_space<vmem>>, vector<4x32xf32>
    %c0_1 = arith.constant 0 : index
    %c0_2 = arith.constant 0 : index
    %1 = vector.load %arg2[%c0_1, %c0_2] : memref<32x128xf32, #tpu.memory_space<vmem>>, vector<32x128xf32>
    %cst = arith.constant dense<0.000000e+00> : vector<4x128xf32>
    %2 = tpu.matmul %0, %1, %cst {dimension_numbers = #tpu.dot_dimension_numbers<[1], [0], [0], [1], [0, 0, 1, 1], [], []>} : vector<4x32xf32>, vector<32x128xf32>, vector<4x128xf32> -> vector<4x128xf32>
    %c0_3 = arith.constant 0 : index
    %c0_4 = arith.constant 0 : index
    %3 = vector.load %arg3[%c0_3, %c0_4] : memref<1x128xf32, #tpu.memory_space<vmem>>, vector<1x128xf32>
    %4 = vector.broadcast %3 : vector<1x128xf32> to vector<4x128xf32>
    %5 = arith.addf %2, %4 : vector<4x128xf32>
    %c0_5 = arith.constant 0 : index
    %c0_6 = arith.constant 0 : index
    %6 = vector.load %arg4[%c0_5, %c0_6] : memref<4x128xf32, #tpu.memory_space<vmem>>, vector<4x128xf32>
    tpu.vector_store %arg4[%c0_5, %c0_6], %5 {strides = array<i32>} : memref<4x128xf32, #tpu.memory_space<vmem>>, vector<4x128xf32>,
    return
  }
  func.func @transform_0(%arg0: i32) -> (i32, i32) {
    %c0_i32 = arith.constant 0 : i32
    %c0_i32_0 = arith.constant 0 : i32
    return %arg0, %c0_i32 : i32, i32
  }
  func.func @transform_1(%arg0: i32) -> (i32, i32) {
    %c0_i32 = arith.constant 0 : i32
    %c0_i32_0 = arith.constant 0 : i32
    %c0_i32_1 = arith.constant 0 : i32
    return %c0_i32, %c0_i32_0 : i32, i32
  }
  func.func @transform_2(%arg0: i32) -> (i32, i32) {
    %c0_i32 = arith.constant 0 : i32
    %c0_i32_0 = arith.constant 0 : i32
    %c0_i32_1 = arith.constant 0 : i32
    return %c0_i32, %c0_i32_0 : i32, i32
  }
  func.func @transform_3(%arg0: i32) -> (i32, i32) {
    %c0_i32 = arith.constant 0 : i32
    %c0_i32_0 = arith.constant 0 : i32
    return %arg0, %c0_i32 : i32, i32
  }
}

</mosaic_0001>

<bundles_post_ra>
// kernel: tile.8
= control target key start
LH: loop header
LB: loop body
LE: loop exit
PB: predicated region body
PF: predicated region fallthrough
CT: control target
= control target key end

     0   :  { %s22_s0 = inlined_call_operand.vmem [shape: f32[32], index: 0, kind: input, shape index: {}]   ;;  %s23_s1 = inlined_call_operand.vmem [shape: f32[4,32], index: 1, kind: output, shape index: {}]  }
   0x1   :  { %v4_v0 = vld [vmem:[%s22_s0] ss:$0 sm:$0xff] }
   0x2   :  { %5 = vst [vmem:[%s23_s1] sm:$0xf] %v4_v0 }

// kernel: tile.9
= control target key start
LH: loop header
LB: loop body
LE: loop exit
PB: predicated region body
PF: predicated region fallthrough
CT: control target
= control target key end

     0   :  { %vm7_vm0 = vcmask 261120   ;;  %s37_s8 = smov 32   ;;  %s38_s9 = smov 64   ;;  %vm13_vm1 = vcmask 1048320   ;;  %vm19_vm2 = vcmask 785920   ;;  %vm25_vm3 = vcmask 523520   ;;  %s55_s0 = inlined_call_operand.vmem [shape: f32[4,32], index: 0, kind: input, shape index: {}]   ;;  %s56_s1 = inlined_call_operand.vmem [shape: f32[1,128], index: 1, kind: output, shape index: {}]  }
   0x1   :  { %v4_v0 = vld [vmem:[%s55_s0] sm:$0xf]  ;;  %s36_s0 = smov 96  }
   0x2   :  { %5 = vst [vmem:[#allocation1] sm:$0xf] %v4_v0 }
   0x9   :  { %v10_v1 = vld [vmem:[#allocation1 + $0x3] sm:$0x1]   ;;  %v22_v2 = vld [vmem:[#allocation1 + $0x1] sm:$0x1]   ;;  %v6_v3 = vld [vmem:[#allocation1] sm:$0x1]  }
   0xa   :  { %11 = vrot.lane.b32.xlu0 %v10_v1, %s36_s0  ;;  %23 = vrot.lane.b32.xlu1 %v22_v2, %s37_s8  ;;  %v16_v4 = vld [vmem:[#allocation1 + $0x2] sm:$0x1]   ;;  %8 = vst.msk [vmem:[#allocation0] sm:$0x1] %vm7_vm0, %v6_v3  }
   0xe   :  { %17 = vrot.lane.b32.xlu0 %v16_v4, %s38_s9 }
  0x7c   :  { %v12_v5 = vpop.permute.xlu0 %11   ;;  %v24_v6 = vpop.permute.xlu1 %23  }
  0x7d   :  { %14 = vst.msk [vmem:[#allocation0] sm:$0x1] %vm13_vm1, %v12_v5  }
  0x80   :  { %v18_v7 = vpop.permute.xlu0 %17  }
  0x81   :  { %20 = vst.msk [vmem:[#allocation0] sm:$0x1] %vm19_vm2, %v18_v7  }
  0x82   :  { %26 = vst.msk [vmem:[#allocation0] sm:$0x1] %vm25_vm3, %v24_v6  }
  0x89   :  { %v30_v8 = vld [vmem:[#allocation0] sm:$0x1] }
  0x8a   :  { %32 = vst [vmem:[%s56_s1] sm:$0x1] %v30_v8 }

// kernel: patch_embeddings_forward.1
= control target key start
LH: loop header
LB: loop body
LE: loop exit
PB: predicated region body
PF: predicated region fallthrough
CT: control target
= control target key end

     0   :  { %v132_v0 = vmov 0.0|0.0   ;;  %vm133_vm0 = vmmov 0   ;;  %v134_v4 = vmov 0.0   ;;  %vm26_vm1 = vcmask 261120   ;;  %s176_s1 = inlined_call_operand.vmem [shape: f32[32,128], index: 1, kind: input, shape index: {}]   ;;  %s177_s0 = inlined_call_operand.vmem [shape: f32[4,32], index: 0, kind: input, shape index: {}]   ;;  %s178_s2 = inlined_call_operand.vmem [shape: f32[1,128], index: 2, kind: input, shape index: {}]   ;;  %s179_s3 = inlined_call_operand.vmem [shape: f32[4,128], index: 3, kind: output, shape index: {}]  }
   0x1   :  { %123 = vmatprep.subr.bf16.mxu0 %v132_v0  ;;  %v15_v1 = vld [vmem:[%s176_s1] sm:$0xff]  ;;  %v16_v2 = vld [vmem:[%s176_s1 + $0x8] sm:$0xff]  ;;  %v17_v3 = vld [vmem:[%s176_s1 + $0x10] sm:$0xff]  ;;  %120 = vmatprep.mubr.msk.f32.mxu0 %vm133_vm0, %v134_v4 }
   0x2   :  { %v124_v5 = vpack.c.bf16 %v16_v2, %v15_v1  ;;  %v18_v6 = vld [vmem:[%s176_s1 + $0x18] sm:$0xff]  ;;  %v14_v8 = vld [vmem:[%s177_s0] sm:$0xf] }
   0x3   :  { %v127_v7 = vpack.c.bf16 %v18_v6, %v17_v3  ;;  %v105_v9 = vld [vmem:[%s178_s2] ss:$0 sm:$0xff] }
   0x4   :  { %125 = vmatpush3.bf16.msra.mxu0 %v124_v5 }
   0x5   :  { %126 = vmatprep.subr.bf16.mxu0 %v132_v0 }
   0x8   :  { %128 = vmatpush3.bf16.msra.mxu0 %v127_v7 }
   0xb   :  { %121 = vmatmul.mubr.msk.f32.vlgmr.msra.gmra.mrb[0].mxu0 %vm26_vm1, %v14_v8 }
  0xde   :  { %v96_v10 = vpop.f32.mrb[0].mxu0 }
  0xdf   :  { %v97_v11 = vadd.f32 %v105_v9, %v96_v10  ;;  %v122_v12 = vpop.f32.mrb[1].mxu0 }
  0xe1   :  { %100 = vst [vmem:[%s179_s3] sm:$0xf] %v97_v11 }

</bundles_post_ra>
